<compile_context>
chip_gen: v7x
topology: tpu7x:2x2x1
jax: 0.10.0
libtpu: 0.0.40
codegen_flags: <defaults>
</compile_context>

<pallas_src>
import functools
import math

import jax
import jax.numpy as jnp
import numpy as np
from jax.experimental import pallas as pl
from jax.experimental.pallas import tpu as pltpu

NX = 2
NU = 1
HSIZES = [20, 20, 20, 20]
TILE_B_DEFAULT = 512   # sweep 512-2048 for large B; keep B // tile_b >= 2 on v7x


def _round_up(n, m):
    return ((n + m - 1) // m) * m


def _mlp_kernel(x_ref,
                w1, b1, w2, b2, w3, b3, w4, b4, w5, b5,
                o_ref):
    """Fused 5-layer MLP: four Linear+ReLU, final Linear. All operands in VMEM."""
    h = x_ref[...]
    layers = ((w1, b1, True), (w2, b2, True), (w3, b3, True),
              (w4, b4, True), (w5, b5, False))
    for w_ref, b_ref, relu in layers:
        h = jnp.dot(h, w_ref[...], preferred_element_type=jnp.float32) + b_ref[...]
        if relu:
            h = jnp.maximum(h, 0.0)
    o_ref[...] = h.astype(o_ref.dtype)


def init_params(key):
    """PyTorch-style nn.Linear init (uniform +-1/sqrt(fan_in)).

    Returns list of (W, b) with W of shape (d_in, d_out) and b of (d_out,).
    """
    dims = [NX] + HSIZES + [NU]
    params = []
    for i, (d_in, d_out) in enumerate(zip(dims[:-1], dims[1:])):
        kw, kb = jax.random.split(jax.random.fold_in(key, i))
        bound = 1.0 / math.sqrt(d_in)
        w = jax.random.uniform(kw, (d_in, d_out), jnp.float32, -bound, bound)
        b = jax.random.uniform(kb, (d_out,), jnp.float32, -bound, bound)
        params.append((w, b))
    return params


@functools.partial(jax.jit, static_argnames=("tile_b",))
def _mlp_forward_impl(x, flat_params, tile_b):
    B = x.shape[0]
    b_pad = _round_up(B, tile_b)

    x_in = x
    if b_pad != B:
        x_in = jnp.pad(x, ((0, b_pad - B), (0, 0)))

    # True (unpadded) feature dims everywhere: full-array block shapes are
    # legal and Mosaic lane-pads internally in VMEM, so HBM traffic stays
    # minimal.  Weight/bias block indices are constant across the grid, so
    # they are DMA'd once and stay VMEM-resident.
    in_specs = [pl.BlockSpec((tile_b, NX), lambda i: (i, 0))]
    for p in flat_params:
        shp = p.shape
        in_specs.append(pl.BlockSpec(shp, lambda i: (0, 0)))

    grid = (b_pad // tile_b,)
    out = pl.pallas_call(
        _mlp_kernel,
        out_shape=jax.ShapeDtypeStruct((b_pad, NU), jnp.float32),
        grid_spec=pltpu.PrefetchScalarGridSpec(
            num_scalar_prefetch=0,
            grid=grid,
            in_specs=in_specs,
            out_specs=pl.BlockSpec((tile_b, NU), lambda i: (i, 0)),
        ),
        compiler_params=pltpu.CompilerParams(
            dimension_semantics=("parallel",),
            vmem_limit_bytes=32 * 1024 * 1024,
        ),
    )(x_in, *flat_params)

    return out[:B]


def mlp_forward(x, params, tile_b=TILE_B_DEFAULT):
    """x: (B, NX) float32 -> (B, NU) float32."""
    B = x.shape[0]

    # Batch tile: multiple of 8 sublanes, no larger than the (padded) batch.
    tile_b = max(8, min(int(tile_b), _round_up(B, 8)))
    tile_b = _round_up(tile_b, 8)

    flat_params = []
    for w, b in params:
        flat_params += [w, b.reshape(1, -1)]

    return _mlp_forward_impl(x, tuple(flat_params), tile_b)


def mlp_reference(x, params):
    h = x
    for i, (w, b) in enumerate(params):
        h = h @ w + b
        if i < len(params) - 1:
            h = jnp.maximum(h, 0.0)
    return h


if __name__ == "__main__":
    key = jax.random.PRNGKey(0)
    kx, kp = jax.random.split(key)
    params = init_params(kp)

    # Check 1: batch divides the tile exactly, grid of 2 (exercises the
    # pipeline and v7x megacore sharding).
    B = 128
    x = jax.random.normal(kx, (B, NX), jnp.float32)
    y = jax.block_until_ready(mlp_forward(x, params, tile_b=64))
    y_ref = mlp_reference(x, params)
    np.testing.assert_allclose(np.asarray(y), np.asarray(y_ref),
                               rtol=1e-5, atol=1e-5)
    assert y.shape == (B, NU)

    # Check 2: ragged batch (not a multiple of the tile) via batch padding.
    B2 = 50
    x2 = jax.random.normal(jax.random.fold_in(kx, 1), (B2, NX), jnp.float32)
    y2 = jax.block_until_ready(mlp_forward(x2, params, tile_b=32))
    np.testing.assert_allclose(np.asarray(y2),
                               np.asarray(mlp_reference(x2, params)),
                               rtol=1e-5, atol=1e-5)
    assert y2.shape == (B2, NU)

    print("KERNEL_OK")
</pallas_src>

<mosaic_0001>
module attributes {stable_mosaic.version = 11 : i64} {
  func.func @_mlp_kernel(%arg0: i32, %arg1: memref<64x2xf32, #tpu.memory_space<vmem>>, %arg2: memref<2x20xf32, #tpu.memory_space<vmem>>, %arg3: memref<1x20xf32, #tpu.memory_space<vmem>>, %arg4: memref<20x20xf32, #tpu.memory_space<vmem>>, %arg5: memref<1x20xf32, #tpu.memory_space<vmem>>, %arg6: memref<20x20xf32, #tpu.memory_space<vmem>>, %arg7: memref<1x20xf32, #tpu.memory_space<vmem>>, %arg8: memref<20x20xf32, #tpu.memory_space<vmem>>, %arg9: memref<1x20xf32, #tpu.memory_space<vmem>>, %arg10: memref<20x1xf32, #tpu.memory_space<vmem>>, %arg11: memref<1x1xf32, #tpu.memory_space<vmem>>, %arg12: memref<64x1xf32, #tpu.memory_space<vmem>>) attributes {dimension_semantics = [#tpu.dimension_semantics<parallel>], iteration_bounds = array<i64: 2>, scalar_prefetch = 0 : i64, scratch_operands = 0 : i64, tpu.core_type = #tpu.core_type<tc>, window_params = [{transform_indices = @transform_0, window_bounds = array<i64: 64, 2>}, {pipeline_mode = #tpu.pipeline_mode<synchronous>, transform_indices = @transform_1, window_bounds = array<i64: 2, 20>}, {pipeline_mode = #tpu.pipeline_mode<synchronous>, transform_indices = @transform_2, window_bounds = array<i64: 1, 20>}, {pipeline_mode = #tpu.pipeline_mode<synchronous>, transform_indices = @transform_3, window_bounds = array<i64: 20, 20>}, {pipeline_mode = #tpu.pipeline_mode<synchronous>, transform_indices = @transform_4, window_bounds = array<i64: 1, 20>}, {pipeline_mode = #tpu.pipeline_mode<synchronous>, transform_indices = @transform_5, window_bounds = array<i64: 20, 20>}, {pipeline_mode = #tpu.pipeline_mode<synchronous>, transform_indices = @transform_6, window_bounds = array<i64: 1, 20>}, {pipeline_mode = #tpu.pipeline_mode<synchronous>, transform_indices = @transform_7, window_bounds = array<i64: 20, 20>}, {pipeline_mode = #tpu.pipeline_mode<synchronous>, transform_indices = @transform_8, window_bounds = array<i64: 1, 20>}, {pipeline_mode = #tpu.pipeline_mode<synchronous>, transform_indices = @transform_9, window_bounds = array<i64: 20, 1>}, {pipeline_mode = #tpu.pipeline_mode<synchronous>, transform_indices = @transform_10, window_bounds = array<i64: 1, 1>}, {transform_indices = @transform_11, window_bounds = array<i64: 64, 1>}]} {
    %c0 = arith.constant 0 : index
    %c0_0 = arith.constant 0 : index
    %0 = vector.load %arg1[%c0, %c0_0] : memref<64x2xf32, #tpu.memory_space<vmem>>, vector<64x2xf32>
    %c0_1 = arith.constant 0 : index
    %c0_2 = arith.constant 0 : index
    %1 = vector.load %arg2[%c0_1, %c0_2] : memref<2x20xf32, #tpu.memory_space<vmem>>, vector<2x20xf32>
    %cst = arith.constant dense<0.000000e+00> : vector<64x20xf32>
    %2 = tpu.matmul %0, %1, %cst {dimension_numbers = #tpu.dot_dimension_numbers<[1], [0], [0], [1], [0, 0, 1, 1], [], []>} : vector<64x2xf32>, vector<2x20xf32>, vector<64x20xf32> -> vector<64x20xf32>
    %c0_3 = arith.constant 0 : index
    %c0_4 = arith.constant 0 : index
    %3 = vector.load %arg3[%c0_3, %c0_4] : memref<1x20xf32, #tpu.memory_space<vmem>>, vector<1x20xf32>
    %4 = vector.broadcast %3 : vector<1x20xf32> to vector<64x20xf32>
    %5 = arith.addf %2, %4 : vector<64x20xf32>
    %cst_5 = arith.constant 0.000000e+00 : f32
    %6 = vector.broadcast %cst_5 : f32 to vector<64x20xf32>
    %7 = arith.maximumf %5, %6 : vector<64x20xf32>
    %c0_6 = arith.constant 0 : index
    %c0_7 = arith.constant 0 : index
    %8 = vector.load %arg4[%c0_6, %c0_7] : memref<20x20xf32, #tpu.memory_space<vmem>>, vector<20x20xf32>
    %cst_8 = arith.constant dense<0.000000e+00> : vector<64x20xf32>
    %9 = tpu.matmul %7, %8, %cst_8 {dimension_numbers = #tpu.dot_dimension_numbers<[1], [0], [0], [1], [0, 0, 1, 1], [], []>} : vector<64x20xf32>, vector<20x20xf32>, vector<64x20xf32> -> vector<64x20xf32>
    %c0_9 = arith.constant 0 : index
    %c0_10 = arith.constant 0 : index
    %10 = vector.load %arg5[%c0_9, %c0_10] : memref<1x20xf32, #tpu.memory_space<vmem>>, vector<1x20xf32>
    %11 = vector.broadcast %10 : vector<1x20xf32> to vector<64x20xf32>
    %12 = arith.addf %9, %11 : vector<64x20xf32>
    %cst_11 = arith.constant 0.000000e+00 : f32
    %13 = vector.broadcast %cst_11 : f32 to vector<64x20xf32>
    %14 = arith.maximumf %12, %13 : vector<64x20xf32>
    %c0_12 = arith.constant 0 : index
    %c0_13 = arith.constant 0 : index
    %15 = vector.load %arg6[%c0_12, %c0_13] : memref<20x20xf32, #tpu.memory_space<vmem>>, vector<20x20xf32>
    %cst_14 = arith.constant dense<0.000000e+00> : vector<64x20xf32>
    %16 = tpu.matmul %14, %15, %cst_14 {dimension_numbers = #tpu.dot_dimension_numbers<[1], [0], [0], [1], [0, 0, 1, 1], [], []>} : vector<64x20xf32>, vector<20x20xf32>, vector<64x20xf32> -> vector<64x20xf32>
    %c0_15 = arith.constant 0 : index
    %c0_16 = arith.constant 0 : index
    %17 = vector.load %arg7[%c0_15, %c0_16] : memref<1x20xf32, #tpu.memory_space<vmem>>, vector<1x20xf32>
    %18 = vector.broadcast %17 : vector<1x20xf32> to vector<64x20xf32>
    %19 = arith.addf %16, %18 : vector<64x20xf32>
    %cst_17 = arith.constant 0.000000e+00 : f32
    %20 = vector.broadcast %cst_17 : f32 to vector<64x20xf32>
    %21 = arith.maximumf %19, %20 : vector<64x20xf32>
    %c0_18 = arith.constant 0 : index
    %c0_19 = arith.constant 0 : index
    %22 = vector.load %arg8[%c0_18, %c0_19] : memref<20x20xf32, #tpu.memory_space<vmem>>, vector<20x20xf32>
    %cst_20 = arith.constant dense<0.000000e+00> : vector<64x20xf32>
    %23 = tpu.matmul %21, %22, %cst_20 {dimension_numbers = #tpu.dot_dimension_numbers<[1], [0], [0], [1], [0, 0, 1, 1], [], []>} : vector<64x20xf32>, vector<20x20xf32>, vector<64x20xf32> -> vector<64x20xf32>
    %c0_21 = arith.constant 0 : index
    %c0_22 = arith.constant 0 : index
    %24 = vector.load %arg9[%c0_21, %c0_22] : memref<1x20xf32, #tpu.memory_space<vmem>>, vector<1x20xf32>
    %25 = vector.broadcast %24 : vector<1x20xf32> to vector<64x20xf32>
    %26 = arith.addf %23, %25 : vector<64x20xf32>
    %cst_23 = arith.constant 0.000000e+00 : f32
    %27 = vector.broadcast %cst_23 : f32 to vector<64x20xf32>
    %28 = arith.maximumf %26, %27 : vector<64x20xf32>
    %c0_24 = arith.constant 0 : index
    %c0_25 = arith.constant 0 : index
    %29 = vector.load %arg10[%c0_24, %c0_25] : memref<20x1xf32, #tpu.memory_space<vmem>>, vector<20x1xf32>
    %cst_26 = arith.constant dense<0.000000e+00> : vector<64x1xf32>
    %30 = tpu.matmul %28, %29, %cst_26 {dimension_numbers = #tpu.dot_dimension_numbers<[1], [0], [0], [1], [0, 0, 1, 1], [], []>} : vector<64x20xf32>, vector<20x1xf32>, vector<64x1xf32> -> vector<64x1xf32>
    %c0_27 = arith.constant 0 : index
    %c0_28 = arith.constant 0 : index
    %31 = vector.load %arg11[%c0_27, %c0_28] : memref<1x1xf32, #tpu.memory_space<vmem>>, vector<1x1xf32>
    %32 = vector.broadcast %31 : vector<1x1xf32> to vector<64x1xf32>
    %33 = arith.addf %30, %32 : vector<64x1xf32>
    %c0_29 = arith.constant 0 : index
    %c0_30 = arith.constant 0 : index
    %34 = vector.load %arg12[%c0_29, %c0_30] : memref<64x1xf32, #tpu.memory_space<vmem>>, vector<64x1xf32>
    tpu.vector_store %arg12[%c0_29, %c0_30], %33 {strides = array<i32>} : memref<64x1xf32, #tpu.memory_space<vmem>>, vector<64x1xf32>,
    return
  }
  func.func @transform_0(%arg0: i32) -> (i32, i32) {
    %c0_i32 = arith.constant 0 : i32
    %c0_i32_0 = arith.constant 0 : i32
    return %arg0, %c0_i32 : i32, i32
  }
  func.func @transform_1(%arg0: i32) -> (i32, i32) {
    %c0_i32 = arith.constant 0 : i32
    %c0_i32_0 = arith.constant 0 : i32
    %c0_i32_1 = arith.constant 0 : i32
    return %c0_i32, %c0_i32_0 : i32, i32
  }
  func.func @transform_2(%arg0: i32) -> (i32, i32) {
    %c0_i32 = arith.constant 0 : i32
    %c0_i32_0 = arith.constant 0 : i32
    %c0_i32_1 = arith.constant 0 : i32
    return %c0_i32, %c0_i32_0 : i32, i32
  }
  func.func @transform_3(%arg0: i32) -> (i32, i32) {
    %c0_i32 = arith.constant 0 : i32
    %c0_i32_0 = arith.constant 0 : i32
    %c0_i32_1 = arith.constant 0 : i32
    return %c0_i32, %c0_i32_0 : i32, i32
  }
  func.func @transform_4(%arg0: i32) -> (i32, i32) {
    %c0_i32 = arith.constant 0 : i32
    %c0_i32_0 = arith.constant 0 : i32
    %c0_i32_1 = arith.constant 0 : i32
    return %c0_i32, %c0_i32_0 : i32, i32
  }
  func.func @transform_5(%arg0: i32) -> (i32, i32) {
    %c0_i32 = arith.constant 0 : i32
    %c0_i32_0 = arith.constant 0 : i32
    %c0_i32_1 = arith.constant 0 : i32
    return %c0_i32, %c0_i32_0 : i32, i32
  }
  func.func @transform_6(%arg0: i32) -> (i32, i32) {
    %c0_i32 = arith.constant 0 : i32
    %c0_i32_0 = arith.constant 0 : i32
    %c0_i32_1 = arith.constant 0 : i32
    return %c0_i32, %c0_i32_0 : i32, i32
  }
  func.func @transform_7(%arg0: i32) -> (i32, i32) {
    %c0_i32 = arith.constant 0 : i32
    %c0_i32_0 = arith.constant 0 : i32
    %c0_i32_1 = arith.constant 0 : i32
    return %c0_i32, %c0_i32_0 : i32, i32
  }
  func.func @transform_8(%arg0: i32) -> (i32, i32) {
    %c0_i32 = arith.constant 0 : i32
    %c0_i32_0 = arith.constant 0 : i32
    %c0_i32_1 = arith.constant 0 : i32
    return %c0_i32, %c0_i32_0 : i32, i32
  }
  func.func @transform_9(%arg0: i32) -> (i32, i32) {
    %c0_i32 = arith.constant 0 : i32
    %c0_i32_0 = arith.constant 0 : i32
    %c0_i32_1 = arith.constant 0 : i32
    return %c0_i32, %c0_i32_0 : i32, i32
  }
  func.func @transform_10(%arg0: i32) -> (i32, i32) {
    %c0_i32 = arith.constant 0 : i32
    %c0_i32_0 = arith.constant 0 : i32
    %c0_i32_1 = arith.constant 0 : i32
    return %c0_i32, %c0_i32_0 : i32, i32
  }
  func.func @transform_11(%arg0: i32) -> (i32, i32) {
    %c0_i32 = arith.constant 0 : i32
    %c0_i32_0 = arith.constant 0 : i32
    return %arg0, %c0_i32 : i32, i32
  }
}

</mosaic_0001>

<bundles_post_ra>
// kernel: _mlp_forward_impl.1
= control target key start
LH: loop header
LB: loop body
LE: loop exit
PB: predicated region body
PF: predicated region fallthrough
CT: control target
= control target key end

     0   :  { %s1506_s19 = smov 0   ;;  %s1637_s0 = inlined_call_operand.vmem [shape: f32[128,2], index: 0, kind: input, shape index: {}]   ;;  %s1638_s1 = inlined_call_operand.vmem [shape: f32[2,20], index: 1, kind: input, shape index: {}]   ;;  %s1639_s2 = inlined_call_operand.vmem [shape: f32[1,20], index: 2, kind: input, shape index: {}]   ;;  %s1640_s3 = inlined_call_operand.vmem [shape: f32[20,20], index: 3, kind: input, shape index: {}]   ;;  %s1641_s4 = inlined_call_operand.vmem [shape: f32[1,20], index: 4, kind: input, shape index: {}]   ;;  %s1642_s5 = inlined_call_operand.vmem [shape: f32[20,20], index: 5, kind: input, shape index: {}]   ;;  %s1643_s6 = inlined_call_operand.vmem [shape: f32[1,20], index: 6, kind: input, shape index: {}]   ;;  %s1644_s7 = inlined_call_operand.vmem [shape: f32[20,20], index: 7, kind: input, shape index: {}]   ;;  %s1645_s8 = inlined_call_operand.vmem [shape: f32[1,20], index: 8, kind: input, shape index: {}]   ;;  %s1646_s9 = inlined_call_operand.vmem [shape: f32[20,1], index: 9, kind: input, shape index: {}]   ;;  %s1647_s10 = inlined_call_operand.<no memory space> [shape: f32[1,1], index: 10, kind: input, shape index: {}]   ;;  %s1648_s11 = inlined_call_operand.vmem [shape: f32[128,1], index: 11, kind: output, shape index: {}]  }
   0x1   :  { %v16_v0 = vstv %s1647_s10 }
   0x2   :  { %17 = vst [vmem:[#allocation2] sm:$0x1] %v16_v0 }
   0x3 LB: > { %s1209_s20 = sadd.s32 4294967295, %s1441_s19   ;;  %p1213_p0 = scmp.ge.s32.totalorder %s1441_s19, 1  ;;  %s1441_s19 = sphi %s1506_s19, %s23_s19  }
   0x4   : > { %p340_p1 = scmp.lt.s32.totalorder %s1441_s19, 3 }
   0x6   : > { %p341_p2 = pnand %p1213_p0, %p340_p1 }
   0x7   : > { %v400_v1 = vld [vmem:[%s1638_s1] sm:$0x3] (!%p341_p2)  ;;  %vm433_vm0 = vcmask (!%p341_p2), 1041408   ;;  %s1214_s10 = sshll.u32 (!%p341_p2), %s1209_s20, 3  ;;  %v551_v3 = vld [vmem:[%s1640_s3 + $0x8] sm:$0xff] (!%p341_p2)  ;;  %vm408_vm1 = vcmask (!%p341_p2), 15360  }
   0x8   : > { %344 = sbr.rel (%p341_p2) target bundleno = 1120 (0x460), region = 64  ;;  %v550_v2 = vld [vmem:[%s1640_s3] sm:$0xff] (!%p341_p2)  ;;  %1323 = vmatprep.subr.msk.mxu0 (!%p341_p2), %vm433_vm0, %v400_v1  ;;  %p381_p3 = scmp.lt.s32.totalorder (!%p341_p2), %s1214_s10, 15  ;;  %1425 = vmatprep.subr.msk.mxu1 (!%p341_p2), %vm433_vm0, %v400_v1  ;;  %v552_v13 = vld [vmem:[%s1640_s3 + $0x10] sm:$0xf] (!%p341_p2)  ;;  %vm585_vm2 = vcmask (!%p341_p2), 1043456  }
   0x9   : > { %1324 = vmatpush3.msk.msra.mxu0 (!%p341_p2), %vm433_vm0, %v400_v1  ;;  %1426 = vmatpush3.msk.msra.mxu1 (!%p341_p2), %vm433_vm0, %v400_v1  ;;  %v1409_v4 = vpack.c.bf16 (!%p341_p2), %v551_v3, %v550_v2  ;;  %v702_v14 = vld [vmem:[%s1642_s5] sm:$0xff] (!%p341_p2)  ;;  %v703_v15 = vld [vmem:[%s1642_s5 + $0x8] sm:$0xff] (!%p341_p2)  ;;  %vm560_vm3 = vcmask (!%p341_p2), 162816   ;;  %v704_v42 = vld [vmem:[%s1642_s5 + $0x10] sm:$0xf] (!%p341_p2)  ;;  %vm1144_vm4 = vcmask (!%p341_p2), 7168  }
   0xa   : > { %v1413_v16 = vpack.c.bf16 (!%p341_p2), %v703_v15, %v702_v14  ;;  %v1218_v17 = vld [vmem:[%s1639_s2] ss:$0 sm:$0xff] (!%p341_p2)  ;;  %v853_v44 = vld [vmem:[%s1644_s7 + $0x8] sm:$0xff] (!%p341_p2)  ;;  %v854_v46 = vld [vmem:[%s1644_s7 + $0x10] sm:$0xf] (!%p341_p2) }
   0xb   : > { %1410 = vmatprep.subr.bf16.mxu1 (!%p341_p2), %v1409_v4  ;;  %v852_v43 = vld [vmem:[%s1644_s7] sm:$0xff] (!%p341_p2) }
   0xc   : > { %1414 = vmatprep.subr.bf16.mxu0 (!%p341_p2), %v1413_v16  ;;  %v1417_v45 = vpack.c.bf16 (!%p341_p2), %v853_v44, %v852_v43  ;;  %v1228_v47 = vld [vmem:[%s1641_s4] ss:$0 sm:$0xff] (!%p341_p2) }
   0xf   : > { %s1650_s10 = smov (!%p381_p3, %s1214_s10), 15 }
  0x10   : > { %s1215_s27 = sshll.u32 %s1650_s10, 3 }
  0x11   : > { %s384_s30 = scalar_lea.vmem %s1637_s0, %s1215_s27  ;;  %s390_s26 = scalar_lea.vmem %s1648_s11, %s1215_s27 }
  0x12   : > { %v392_v5 = vld [vmem:[%s384_s30] sm:$0xff]  ;;  %v393_v6 = vld [vmem:[%s384_s30 + $0x8] sm:$0xff]  ;;  %v394_v7 = vld [vmem:[%s384_s30 + $0x10] sm:$0xff] }
  0x13   : > { %1325 = vmatprep.mubr.msk.f32.mxu0 %vm408_vm1, %v392_v5  ;;  %v396_v8 = vld [vmem:[%s384_s30 + $0x20] sm:$0xff]  ;;  %v397_v9 = vld [vmem:[%s384_s30 + $0x28] sm:$0xff]  ;;  %v398_v10 = vld [vmem:[%s384_s30 + $0x30] sm:$0xff] }
  0x14   : > { %1326 = vmatmul.mubr.msk.f32.vlgmr.msra.gmra.mrb[0].mxu0 %vm408_vm1, %v393_v6  ;;  %1331 = vmatprep.mubr.msk.f32.mxu1 %vm408_vm1, %v396_v8  ;;  %v395_v11 = vld [vmem:[%s384_s30 + $0x18] sm:$0xff]  ;;  %v1002_v8 = vld [vmem:[%s1646_s9] sm:$0xff] }
  0x15   : > { %1328 = vmatprep.mubr.msk.f32.mxu0 %vm408_vm1, %v394_v7  ;;  %1332 = vmatmul.mubr.msk.f32.vlgmr.msra.gmra.mrb[0].mxu1 %vm408_vm1, %v397_v9  ;;  %v399_v12 = vld [vmem:[%s384_s30 + $0x38] sm:$0xff]  ;;  %v1003_v9 = vld [vmem:[%s1646_s9 + $0x8] sm:$0xff] }
  0x16   : > { %1334 = vmatprep.mubr.msk.f32.mxu1 %vm408_vm1, %v398_v10  ;;  %1412 = vmatpush3.bf16.msra.mxu1 %v1409_v4  ;;  %v1421_v10 = vpack.c.bf16 %v1003_v9, %v1002_v8 }
  0x17   : > { %1341 = vmatprep.subr.msk.mxu1 %vm585_vm2, %v552_v13  ;;  %1416 = vmatpush3.bf16.msra.mxu0 %v1413_v16 }
  0x18   : > { %1329 = vmatmul.mubr.msk.f32.gmra.mrb[2].mxu0 %vm408_vm1, %v395_v11  ;;  %1359 = vmatprep.subr.msk.mxu0 %vm585_vm2, %v704_v42  ;;  %v1004_v11 = vld [vmem:[%s1646_s9 + $0x10] sm:$0xf] }
  0x19   : > { %1335 = vmatmul.mubr.msk.f32.gmra.mrb[2].mxu1 %vm408_vm1, %v399_v12  ;;  %v1238_v12 = vld [vmem:[%s1643_s6] ss:$0 sm:$0xff] }
  0x1a   : > { %1342 = vmatpush3.msk.msra.mxu1 %vm585_vm2, %v552_v13 }
  0x1b   : > { %1360 = vmatpush3.msk.msra.mxu0 %vm585_vm2, %v704_v42  ;;  %1418 = vmatprep.subr.bf16.mxu1 %v1417_v45 }
  0x1c   : > { %1422 = vmatprep.subr.bf16.mxu0 %v1421_v10 }
  0xe7   : > { %v1327_v18 = vpop.f32.mrb[0].mxu0 }
  0xe8   : > { %v509_v19 = vadd.f32 %v1327_v18, %v1218_v17  ;;  %v503_v20 = vpop.f32.mrb[1].mxu0  ;;  %v1333_v21 = vpop.f32.mrb[0].mxu1 }
  0xe9   : > { %v504_v22 = vadd.f32 %v1218_v17, %v503_v20  ;;  %v523_v23 = vpop.f32.mrb[1].mxu1  ;;  %v529_v37 = vadd.f32 %v1333_v21, %v1218_v17 }
  0xea   : > { %v524_v26 = vadd.f32 %v1218_v17, %v523_v23  ;;  %v543_v27 = vmax.f32 %v509_v19, 0.0 }
  0xeb   : > { %v542_v24 = vmax.f32 %v504_v22, 0.0  ;;  %v1330_v25 = vpop.f32.mrb[2].mxu0  ;;  %v547_v39 = vmax.f32 %v529_v37, 0.0  ;;  %v1248_v37 = vld [vmem:[%s1645_s8] ss:$0 sm:$0xff] }
  0xec   : > { %v519_v28 = vadd.f32 %v1330_v25, %v1218_v17  ;;  %v513_v29 = vpop.f32.mrb[3].mxu0  ;;  %v1336_v30 = vpop.f32.mrb[2].mxu1  ;;  %v546_v34 = vmax.f32 %v524_v26, 0.0 }
  0xed   : > { %v514_v31 = vadd.f32 %v1218_v17, %v513_v29  ;;  %1343 = vmatprep.mubr.msk.f32.mxu1 %vm560_vm3, %v542_v24  ;;  %v533_v32 = vpop.f32.mrb[3].mxu1  ;;  %v539_v40 = vadd.f32 %v1336_v30, %v1218_v17 }
  0xee   : > { %1344 = vmatmul.mubr.msk.f32.vlgmr.msra.gmra.mrb[4].mxu1 %vm560_vm3, %v543_v27  ;;  %v534_v35 = vadd.f32 %v1218_v17, %v533_v32  ;;  %v545_v36 = vmax.f32 %v519_v28, 0.0 }
  0xef   : > { %v544_v33 = vmax.f32 %v514_v31, 0.0  ;;  %v549_v41 = vmax.f32 %v539_v40, 0.0  ;;  %1420 = vmatpush3.bf16.msra.mxu1 %v1417_v45 }
  0xf0   : > { %v548_v38 = vmax.f32 %v534_v35, 0.0  ;;  %1377 = vmatprep.subr.msk.mxu1 %vm585_vm2, %v854_v46 }
  0xf1   : > { %1346 = vmatprep.mubr.msk.f32.mxu1 %vm560_vm3, %v544_v33 }
  0xf2   : > { %1347 = vmatmul.mubr.msk.f32.gmra.mrb[6].mxu1 %vm560_vm3, %v545_v36 }
  0xf3   : > { %1349 = vmatprep.mubr.msk.f32.mxu1 %vm560_vm3, %v546_v34  ;;  %1378 = vmatpush3.msk.msra.mxu1 %vm585_vm2, %v854_v46 }
  0xf6   : > { %1350 = vmatmul.mubr.msk.f32.gmra.mrb[8].mxu1 %vm560_vm3, %v547_v39 }
  0xf7   : > { %1352 = vmatprep.mubr.msk.f32.mxu1 %vm560_vm3, %v548_v38 }
  0xfa   : > { %1353 = vmatmul.mubr.msk.f32.gmra.mrb[10].mxu1 %vm560_vm3, %v549_v41 }
 0x1c1   : > { %v1345_v48 = vpop.f32.mrb[4].mxu1 }
 0x1c2   : > { %v661_v49 = vadd.f32 %v1345_v48, %v1228_v47  ;;  %v655_v50 = vpop.f32.mrb[5].mxu1 }
 0x1c3   : > { %v656_v51 = vadd.f32 %v1228_v47, %v655_v50 }
 0x1c4   : > { %v695_v54 = vmax.f32 %v661_v49, 0.0 }
 0x1c5   : > { %v694_v52 = vmax.f32 %v656_v51, 0.0  ;;  %v1348_v53 = vpop.f32.mrb[6].mxu1 }
 0x1c6   : > { %v671_v55 = vadd.f32 %v1348_v53, %v1228_v47  ;;  %v665_v56 = vpop.f32.mrb[7].mxu1 }
 0x1c7   : > { %v666_v57 = vadd.f32 %v1228_v47, %v665_v56  ;;  %1361 = vmatprep.mubr.msk.f32.mxu0 %vm560_vm3, %v694_v52 }
 0x1c8   : > { %1362 = vmatmul.mubr.msk.f32.vlgmr.msra.gmra.mrb[4].mxu0 %vm560_vm3, %v695_v54  ;;  %v697_v60 = vmax.f32 %v671_v55, 0.0 }
 0x1c9   : > { %v696_v58 = vmax.f32 %v666_v57, 0.0  ;;  %v1351_v59 = vpop.f32.mrb[8].mxu1  ;;  %1424 = vmatpush3.bf16.msra.mxu0 %v1421_v10 }
 0x1ca   : > { %v681_v61 = vadd.f32 %v1351_v59, %v1228_v47  ;;  %v675_v62 = vpop.f32.mrb[9].mxu1  ;;  %1395 = vmatprep.subr.msk.mxu0 %vm585_vm2, %v1004_v11 }
 0x1cb   : > { %v676_v63 = vadd.f32 %v1228_v47, %v675_v62  ;;  %1364 = vmatprep.mubr.msk.f32.mxu0 %vm560_vm3, %v696_v58  ;;  %v1258_v62 = vld [vmem:[#allocation2] ss:$0 sm:$0xff] }
 0x1cc   : > { %1365 = vmatmul.mubr.msk.f32.gmra.mrb[6].mxu0 %vm560_vm3, %v697_v60  ;;  %v699_v2 = vmax.f32 %v681_v61, 0.0 }
 0x1cd   : > { %v698_v0 = vmax.f32 %v676_v63, 0.0  ;;  %v1354_v1 = vpop.f32.mrb[10].mxu1  ;;  %1396 = vmatpush3.msk.msra.mxu0 %vm585_vm2, %v1004_v11 }
 0x1ce   : > { %v691_v3 = vadd.f32 %v1354_v1, %v1228_v47  ;;  %v685_v4 = vpop.f32.mrb[11].mxu1 }
 0x1cf   : > { %v686_v5 = vadd.f32 %v1228_v47, %v685_v4  ;;  %1367 = vmatprep.mubr.msk.f32.mxu0 %vm560_vm3, %v698_v0 }
 0x1d0   : > { %1368 = vmatmul.mubr.msk.f32.gmra.mrb[8].mxu0 %vm560_vm3, %v699_v2  ;;  %v701_v7 = vmax.f32 %v691_v3, 0.0 }
 0x1d1   : > { %v700_v6 = vmax.f32 %v686_v5, 0.0 }
 0x1d3   : > { %1370 = vmatprep.mubr.msk.f32.mxu0 %vm560_vm3, %v700_v6 }
 0x1d4   : > { %1371 = vmatmul.mubr.msk.f32.gmra.mrb[10].mxu0 %vm560_vm3, %v701_v7 }
 0x29b   : > { %v1363_v13 = vpop.f32.mrb[4].mxu0 }
 0x29c   : > { %v811_v14 = vadd.f32 %v1363_v13, %v1238_v12  ;;  %v805_v15 = vpop.f32.mrb[5].mxu0 }
 0x29d   : > { %v806_v16 = vadd.f32 %v1238_v12, %v805_v15 }
 0x29e   : > { %v845_v19 = vmax.f32 %v811_v14, 0.0 }
 0x29f   : > { %v844_v17 = vmax.f32 %v806_v16, 0.0  ;;  %v1366_v18 = vpop.f32.mrb[6].mxu0 }
 0x2a0   : > { %v821_v20 = vadd.f32 %v1366_v18, %v1238_v12  ;;  %v815_v21 = vpop.f32.mrb[7].mxu0 }
 0x2a1   : > { %v816_v22 = vadd.f32 %v1238_v12, %v815_v21  ;;  %1379 = vmatprep.mubr.msk.f32.mxu1 %vm560_vm3, %v844_v17 }
 0x2a2   : > { %1380 = vmatmul.mubr.msk.f32.vlgmr.msra.gmra.mrb[12].mxu1 %vm560_vm3, %v845_v19  ;;  %v847_v25 = vmax.f32 %v821_v20, 0.0 }
 0x2a3   : > { %v846_v23 = vmax.f32 %v816_v22, 0.0  ;;  %v1369_v24 = vpop.f32.mrb[8].mxu0 }
 0x2a4   : > { %v831_v26 = vadd.f32 %v1369_v24, %v1238_v12  ;;  %v825_v27 = vpop.f32.mrb[9].mxu0 }
 0x2a5   : > { %v826_v28 = vadd.f32 %v1238_v12, %v825_v27  ;;  %1382 = vmatprep.mubr.msk.f32.mxu1 %vm560_vm3, %v846_v23 }
 0x2a6   : > { %1383 = vmatmul.mubr.msk.f32.gmra.mrb[14].mxu1 %vm560_vm3, %v847_v25  ;;  %v849_v31 = vmax.f32 %v831_v26, 0.0 }
 0x2a7   : > { %v848_v29 = vmax.f32 %v826_v28, 0.0  ;;  %v1372_v30 = vpop.f32.mrb[10].mxu0 }
 0x2a8   : > { %v841_v32 = vadd.f32 %v1372_v30, %v1238_v12  ;;  %v835_v33 = vpop.f32.mrb[11].mxu0 }
 0x2a9   : > { %v836_v34 = vadd.f32 %v1238_v12, %v835_v33  ;;  %1385 = vmatprep.mubr.msk.f32.mxu1 %vm560_vm3, %v848_v29 }
 0x2aa   : > { %1386 = vmatmul.mubr.msk.f32.gmra.mrb[16].mxu1 %vm560_vm3, %v849_v31  ;;  %v851_v36 = vmax.f32 %v841_v32, 0.0 }
 0x2ab   : > { %v850_v35 = vmax.f32 %v836_v34, 0.0 }
 0x2ad   : > { %1388 = vmatprep.mubr.msk.f32.mxu1 %vm560_vm3, %v850_v35 }
 0x2ae   : > { %1389 = vmatmul.mubr.msk.f32.gmra.mrb[18].mxu1 %vm560_vm3, %v851_v36 }
 0x375   : > { %v1381_v38 = vpop.f32.mrb[12].mxu1 }
 0x376   : > { %v961_v39 = vadd.f32 %v1381_v38, %v1248_v37  ;;  %v955_v40 = vpop.f32.mrb[13].mxu1 }
 0x377   : > { %v956_v41 = vadd.f32 %v1248_v37, %v955_v40 }
 0x378   : > { %v995_v44 = vmax.f32 %v961_v39, 0.0 }
 0x379   : > { %v994_v42 = vmax.f32 %v956_v41, 0.0  ;;  %v1384_v43 = vpop.f32.mrb[14].mxu1 }
 0x37a   : > { %v971_v45 = vadd.f32 %v1384_v43, %v1248_v37  ;;  %v965_v46 = vpop.f32.mrb[15].mxu1 }
 0x37b   : > { %v966_v47 = vadd.f32 %v1248_v37, %v965_v46  ;;  %1397 = vmatprep.mubr.msk.f32.mxu0 %vm560_vm3, %v994_v42 }
 0x37c   : > { %1398 = vmatmul.mubr.msk.f32.vlgmr.msra.gmra.mrb[12].mxu0 %vm560_vm3, %v995_v44  ;;  %v997_v50 = vmax.f32 %v971_v45, 0.0 }
 0x37d   : > { %v996_v48 = vmax.f32 %v966_v47, 0.0  ;;  %v1387_v49 = vpop.f32.mrb[16].mxu1 }
 0x37e   : > { %v981_v51 = vadd.f32 %v1387_v49, %v1248_v37  ;;  %v975_v52 = vpop.f32.mrb[17].mxu1 }
 0x37f   : > { %v976_v53 = vadd.f32 %v1248_v37, %v975_v52  ;;  %1400 = vmatprep.mubr.msk.f32.mxu0 %vm560_vm3, %v996_v48 }
 0x380   : > { %1401 = vmatmul.mubr.msk.f32.gmra.mrb[14].mxu0 %vm560_vm3, %v997_v50  ;;  %v999_v56 = vmax.f32 %v981_v51, 0.0 }
 0x381   : > { %v998_v54 = vmax.f32 %v976_v53, 0.0  ;;  %v1390_v55 = vpop.f32.mrb[18].mxu1 }
 0x382   : > { %v991_v57 = vadd.f32 %v1390_v55, %v1248_v37  ;;  %v985_v58 = vpop.f32.mrb[19].mxu1 }
 0x383   : > { %v986_v59 = vadd.f32 %v1248_v37, %v985_v58  ;;  %1403 = vmatprep.mubr.msk.f32.mxu0 %vm560_vm3, %v998_v54 }
 0x384   : > { %1404 = vmatmul.mubr.msk.f32.gmra.mrb[16].mxu0 %vm560_vm3, %v999_v56  ;;  %v1001_v61 = vmax.f32 %v991_v57, 0.0 }
 0x385   : > { %v1000_v60 = vmax.f32 %v986_v59, 0.0 }
 0x387   : > { %1406 = vmatprep.mubr.msk.f32.mxu0 %vm560_vm3, %v1000_v60 }
 0x388   : > { %1407 = vmatmul.mubr.msk.f32.gmra.mrb[18].mxu0 %vm560_vm3, %v1001_v61 }
 0x44f   : > { %v1399_v63 = vpop.f32.mrb[12].mxu0 }
 0x450   : > { %v1111_v0 = vadd.f32 %v1399_v63, %v1258_v62  ;;  %v1105_v1 = vpop.f32.mrb[13].mxu0 }
 0x451   : > { %v1106_v2 = vadd.f32 %v1258_v62, %v1105_v1 }
 0x452   : > { %1146 = vst.msk [vmem:[%s390_s26 + $0x8] sm:$0xff] %vm1144_vm4, %v1111_v0 }
 0x453   : > { %1145 = vst.msk [vmem:[%s390_s26] sm:$0xff] %vm1144_vm4, %v1106_v2  ;;  %v1402_v3 = vpop.f32.mrb[14].mxu0 }
 0x454   : > { %v1121_v4 = vadd.f32 %v1402_v3, %v1258_v62  ;;  %v1115_v5 = vpop.f32.mrb[15].mxu0 }
 0x455   : > { %v1116_v6 = vadd.f32 %v1258_v62, %v1115_v5 }
 0x456   : > { %1148 = vst.msk [vmem:[%s390_s26 + $0x18] sm:$0xff] %vm1144_vm4, %v1121_v4 }
 0x457   : > { %1147 = vst.msk [vmem:[%s390_s26 + $0x10] sm:$0xff] %vm1144_vm4, %v1116_v6  ;;  %v1405_v7 = vpop.f32.mrb[16].mxu0 }
 0x458   : > { %v1131_v8 = vadd.f32 %v1405_v7, %v1258_v62  ;;  %v1125_v9 = vpop.f32.mrb[17].mxu0 }
 0x459   : > { %v1126_v10 = vadd.f32 %v1258_v62, %v1125_v9 }
 0x45a   : > { %1150 = vst.msk [vmem:[%s390_s26 + $0x28] sm:$0xff] %vm1144_vm4, %v1131_v8 }
 0x45b   : > { %1149 = vst.msk [vmem:[%s390_s26 + $0x20] sm:$0xff] %vm1144_vm4, %v1126_v10  ;;  %v1408_v11 = vpop.f32.mrb[18].mxu0 }
 0x45c   : > { %v1141_v12 = vadd.f32 %v1408_v11, %v1258_v62  ;;  %v1135_v13 = vpop.f32.mrb[19].mxu0 }
 0x45d   : > { %v1136_v14 = vadd.f32 %v1258_v62, %v1135_v13 }
 0x45e   : > { %1152 = vst.msk [vmem:[%s390_s26 + $0x38] sm:$0xff] %vm1144_vm4, %v1141_v12 }
 0x45f   : > { %1151 = vst.msk [vmem:[%s390_s26 + $0x30] sm:$0xff] %vm1144_vm4, %v1136_v14 }
 0x460 PF: > { %s23_s19 = sadd.s32 1, %s1441_s19  }
 0x461   : > { %p20_p4 = scmp.ge.s32.totalorder %s23_s19, 4  }
 0x463   :  { %22 = sbr.rel (!%p20_p4) target bundleno = 3 (0x3), region = 94 }

</bundles_post_ra>
